<compile_context>
chip_gen: v6e
topology: v6e:2x2x1
jax: 0.10.0
libtpu: 0.0.40
codegen_flags: <defaults>
</compile_context>

<pallas_src>
import functools

import jax
import jax.numpy as jnp
from jax.experimental import pallas as pl
from jax.experimental.pallas import tpu as pltpu


# ----------------------------------------------------------------------------
# Fused CRM kernel: one grid step == TB batch elements.
# ----------------------------------------------------------------------------
def _crm_kernel(x_ref, w1t_ref, w2t_ref, w3t_ref, o_ref):
    # x_ref block: (TB, C, HW), native dtype. Channels on sublanes, spatial on
    # lanes. All math in f32 inside the kernel only.
    xf = x_ref[...].astype(jnp.float32)                      # (TB, C, HW)
    hw = xf.shape[2]

    # Squeeze: global average pool over the spatial (lane) axis.
    pooled = jnp.sum(xf, axis=2) * (1.0 / hw)                # (TB, C)

    # Excitation MLP (bias-free Linears). Weights are pre-transposed, so each
    # dot contracts on the lane axis of the (TB, C)/(TB, cr) row matrices.
    h = jnp.maximum(
        jnp.dot(pooled, w1t_ref[...], preferred_element_type=jnp.float32), 0.0)
    h = jnp.maximum(
        jnp.dot(h, w2t_ref[...], preferred_element_type=jnp.float32), 0.0)
    z = jnp.dot(h, w3t_ref[...], preferred_element_type=jnp.float32)   # (TB, C)

    # Numerically stable sigmoid (exp runs on the EUP slot).
    e = jnp.exp(-jnp.abs(z))
    s = jnp.where(z >= 0.0, 1.0 / (1.0 + e), e / (1.0 + e))            # (TB, C)

    # Recalibrate: broadcast the per-channel scale across the lane axis.
    # Lane-dense store back in the input's dtype.
    o_ref[...] = (xf * s[:, :, None]).astype(o_ref.dtype)


# ----------------------------------------------------------------------------
# Batch-tile selection: ~1-2 MB per block, exact grid, >= 2 grid steps.
# ----------------------------------------------------------------------------
def _pick_batch_tile(batch, per_b_bytes, target_bytes=2 * 1024 * 1024):
    tb = max(1, min(batch, target_bytes // max(per_b_bytes, 1)))
    while tb > 1 and batch % tb != 0:          # keep the grid exact (no ragged tail)
        tb -= 1
    while tb > 1 and (batch // tb) < 2:        # keep >= 2 steps (v7x megacore, pipelining)
        tb //= 2
        while tb > 1 and batch % tb != 0:
            tb -= 1
    return tb


# ----------------------------------------------------------------------------
# Wrapper: NCHW in / NCHW out, matching the PyTorch module interface.
# ----------------------------------------------------------------------------
@functools.partial(jax.jit, donate_argnums=(0,))
def crm_forward(x, w_fc1, w_fc2, w_fc3):
    """CRM forward.

    x:      (B, C, H, W), any float dtype (kept native; donated, written in place)
    w_fc1:  (C // r, C)       nn.Linear(channel, channel//r, bias=False).weight
    w_fc2:  (C // r, C // r)  nn.Linear(channel//r, channel//r, bias=False).weight
    w_fc3:  (C, C // r)       nn.Linear(channel//r, channel, bias=False).weight
    """
    B, C, H, W = x.shape
    HW = H * W
    x3 = x.reshape(B, C, HW)                       # metadata-only reshape, native dtype

    cr = w_fc1.shape[0]
    # Tiny FC weights: cast to f32 and pre-transpose once (resident in VMEM).
    w1t = w_fc1.astype(jnp.float32).T              # (C, cr)
    w2t = w_fc2.astype(jnp.float32).T              # (cr, cr)
    w3t = w_fc3.astype(jnp.float32).T              # (cr, C)

    itemsize = jnp.dtype(x.dtype).itemsize
    per_b_bytes = C * HW * itemsize
    TB = _pick_batch_tile(B, per_b_bytes)
    block_bytes = TB * per_b_bytes
    w_bytes = 4 * (C * cr + cr * cr + cr * C)

    # Double-buffered input + output blocks + resident weights + headroom,
    # clamped to the v7x physical cap (64 MiB) and at least the v5e default.
    vmem_limit = int(min(64 * 1024 * 1024,
                         max(16 * 1024 * 1024,
                             4 * block_bytes + 2 * w_bytes + 4 * 1024 * 1024)))

    cost = pl.CostEstimate(
        flops=int(2 * B * C * HW + 2 * B * (2 * C * cr + cr * cr)),
        transcendentals=int(B * C),
        bytes_accessed=int(2 * B * C * HW * itemsize + w_bytes),
    )

    out = pl.pallas_call(
        _crm_kernel,
        out_shape=jax.ShapeDtypeStruct((B, C, HW), x.dtype),
        grid_spec=pltpu.PrefetchScalarGridSpec(
            num_scalar_prefetch=0,
            grid=(B // TB,),
            in_specs=[
                pl.BlockSpec((TB, C, HW), lambda b: (b, 0, 0)),   # activation tile
                pl.BlockSpec((C, cr), lambda b: (0, 0)),          # fc1.T (resident)
                pl.BlockSpec((cr, cr), lambda b: (0, 0)),         # fc2.T (resident)
                pl.BlockSpec((cr, C), lambda b: (0, 0)),          # fc3.T (resident)
            ],
            out_specs=pl.BlockSpec((TB, C, HW), lambda b: (b, 0, 0)),
        ),
        input_output_aliases={0: 0},                              # rescale x in place
        compiler_params=pltpu.CompilerParams(
            dimension_semantics=("parallel",),
            vmem_limit_bytes=vmem_limit,
        ),
        cost_estimate=cost,
    )(x3, w1t, w2t, w3t)
    return out.reshape(B, C, H, W)


# ----------------------------------------------------------------------------
# Pure-JAX reference (mirrors the PyTorch module exactly).
# ----------------------------------------------------------------------------
def crm_reference(x, w_fc1, w_fc2, w_fc3):
    y = jnp.mean(x, axis=(2, 3))                  # AdaptiveAvgPool2d(1) + view(b, c)
    y = jax.nn.relu(y @ w_fc1.T)
    y = jax.nn.relu(y @ w_fc2.T)
    y = jax.nn.sigmoid(y @ w_fc3.T)
    return x * y[:, :, None, None]


if __name__ == "__main__":
    key = jax.random.PRNGKey(0)
    kx, k1, k2, k3 = jax.random.split(key, 4)

    # Small shapes consistent with the module: channel must be >= reduction (8).
    B, C, H, W, reduction = 2, 16, 16, 16, 8
    cr = C // reduction

    x = jax.random.normal(kx, (B, C, H, W), jnp.float32)
    w_fc1 = 0.3 * jax.random.normal(k1, (cr, C), jnp.float32)
    w_fc2 = 0.3 * jax.random.normal(k2, (cr, cr), jnp.float32)
    w_fc3 = 0.3 * jax.random.normal(k3, (C, cr), jnp.float32)

    # Compute the reference BEFORE the kernel call: `x` is donated to it.
    ref = crm_reference(x, w_fc1, w_fc2, w_fc3)

    out = jax.block_until_ready(crm_forward(x, w_fc1, w_fc2, w_fc3))

    assert out.shape == (B, C, H, W), out.shape
    assert out.dtype == ref.dtype, (out.dtype, ref.dtype)
    assert bool(jnp.all(jnp.isfinite(out)))

    max_err = float(jnp.max(jnp.abs(out - ref)))
    assert max_err < 1e-4, f"mismatch vs reference: {max_err}"

    print("KERNEL_OK")
</pallas_src>

<mosaic_0001>
module attributes {stable_mosaic.version = 11 : i64} {
  func.func @_crm_kernel(%arg0: i32, %arg1: memref<1x16x256xf32, #tpu.memory_space<vmem>>, %arg2: memref<16x2xf32, #tpu.memory_space<vmem>>, %arg3: memref<2x2xf32, #tpu.memory_space<vmem>>, %arg4: memref<2x16xf32, #tpu.memory_space<vmem>>, %arg5: memref<1x16x256xf32, #tpu.memory_space<vmem>>) attributes {dimension_semantics = [#tpu.dimension_semantics<parallel>], iteration_bounds = array<i64: 2>, scalar_prefetch = 0 : i64, scratch_operands = 0 : i64, tpu.core_type = #tpu.core_type<tc>, window_params = [{transform_indices = @transform_0, window_bounds = array<i64: 1, 16, 256>}, {pipeline_mode = #tpu.pipeline_mode<synchronous>, transform_indices = @transform_1, window_bounds = array<i64: 16, 2>}, {pipeline_mode = #tpu.pipeline_mode<synchronous>, transform_indices = @transform_2, window_bounds = array<i64: 2, 2>}, {pipeline_mode = #tpu.pipeline_mode<synchronous>, transform_indices = @transform_3, window_bounds = array<i64: 2, 16>}, {transform_indices = @transform_4, window_bounds = array<i64: 1, 16, 256>}]} {
    %c0 = arith.constant 0 : index
    %c0_0 = arith.constant 0 : index
    %c0_1 = arith.constant 0 : index
    %0 = vector.load %arg1[%c0, %c0_0, %c0_1] : memref<1x16x256xf32, #tpu.memory_space<vmem>>, vector<1x16x256xf32>
    %cst = arith.constant dense<0.000000e+00> : vector<1x16xf32>
    %1 = vector.multi_reduction <add>, %0, %cst [2] : vector<1x16x256xf32> to vector<1x16xf32>
    %cst_2 = arith.constant 3.906250e-03 : f32
    %2 = vector.broadcast %cst_2 : f32 to vector<1x16xf32>
    %3 = arith.mulf %1, %2 : vector<1x16xf32>
    %c0_3 = arith.constant 0 : index
    %c0_4 = arith.constant 0 : index
    %4 = vector.load %arg2[%c0_3, %c0_4] : memref<16x2xf32, #tpu.memory_space<vmem>>, vector<16x2xf32>
    %cst_5 = arith.constant dense<0.000000e+00> : vector<1x2xf32>
    %5 = tpu.matmul %3, %4, %cst_5 {dimension_numbers = #tpu.dot_dimension_numbers<[1], [0], [0], [1], [0, 0, 1, 1], [], []>} : vector<1x16xf32>, vector<16x2xf32>, vector<1x2xf32> -> vector<1x2xf32>
    %cst_6 = arith.constant 0.000000e+00 : f32
    %6 = vector.broadcast %cst_6 : f32 to vector<1x2xf32>
    %7 = arith.maximumf %5, %6 : vector<1x2xf32>
    %c0_7 = arith.constant 0 : index
    %c0_8 = arith.constant 0 : index
    %8 = vector.load %arg3[%c0_7, %c0_8] : memref<2x2xf32, #tpu.memory_space<vmem>>, vector<2x2xf32>
    %cst_9 = arith.constant dense<0.000000e+00> : vector<1x2xf32>
    %9 = tpu.matmul %7, %8, %cst_9 {dimension_numbers = #tpu.dot_dimension_numbers<[1], [0], [0], [1], [0, 0, 1, 1], [], []>} : vector<1x2xf32>, vector<2x2xf32>, vector<1x2xf32> -> vector<1x2xf32>
    %cst_10 = arith.constant 0.000000e+00 : f32
    %10 = vector.broadcast %cst_10 : f32 to vector<1x2xf32>
    %11 = arith.maximumf %9, %10 : vector<1x2xf32>
    %c0_11 = arith.constant 0 : index
    %c0_12 = arith.constant 0 : index
    %12 = vector.load %arg4[%c0_11, %c0_12] : memref<2x16xf32, #tpu.memory_space<vmem>>, vector<2x16xf32>
    %cst_13 = arith.constant dense<0.000000e+00> : vector<1x16xf32>
    %13 = tpu.matmul %11, %12, %cst_13 {dimension_numbers = #tpu.dot_dimension_numbers<[1], [0], [0], [1], [0, 0, 1, 1], [], []>} : vector<1x2xf32>, vector<2x16xf32>, vector<1x16xf32> -> vector<1x16xf32>
    %14 = math.absf %13 : vector<1x16xf32>
    %cst_14 = arith.constant 0.000000e+00 : f32
    %15 = vector.broadcast %cst_14 : f32 to vector<1x16xf32>
    %16 = arith.subf %15, %14 : vector<1x16xf32>
    %17 = math.exp %16 : vector<1x16xf32>
    %cst_15 = arith.constant 0.000000e+00 : f32
    %18 = vector.broadcast %cst_15 : f32 to vector<1x16xf32>
    %19 = arith.cmpf oge, %13, %18 : vector<1x16xf32>
    %cst_16 = arith.constant 1.000000e+00 : f32
    %20 = vector.broadcast %cst_16 : f32 to vector<1x16xf32>
    %21 = arith.addf %20, %17 : vector<1x16xf32>
    %cst_17 = arith.constant 1.000000e+00 : f32
    %22 = vector.broadcast %cst_17 : f32 to vector<1x16xf32>
    %23 = arith.divf %22, %21 : vector<1x16xf32>
    %cst_18 = arith.constant 1.000000e+00 : f32
    %24 = vector.broadcast %cst_18 : f32 to vector<1x16xf32>
    %25 = arith.addf %24, %17 : vector<1x16xf32>
    %26 = arith.divf %17, %25 : vector<1x16xf32>
    %27 = arith.select %19, %23, %26 : vector<1x16xi1>, vector<1x16xf32>
    %28 = vector.shape_cast %27 : vector<1x16xf32> to vector<1x16x1xf32>
    %29 = vector.broadcast %28 : vector<1x16x1xf32> to vector<1x16x256xf32>
    %30 = arith.mulf %0, %29 : vector<1x16x256xf32>
    %c0_19 = arith.constant 0 : index
    %c0_20 = arith.constant 0 : index
    %c0_21 = arith.constant 0 : index
    %31 = vector.load %arg5[%c0_19, %c0_20, %c0_21] : memref<1x16x256xf32, #tpu.memory_space<vmem>>, vector<1x16x256xf32>
    tpu.vector_store %arg5[%c0_19, %c0_20, %c0_21], %30 {strides = array<i32>} : memref<1x16x256xf32, #tpu.memory_space<vmem>>, vector<1x16x256xf32>,
    return
  }
  func.func @transform_0(%arg0: i32) -> (i32, i32, i32) {
    %c0_i32 = arith.constant 0 : i32
    %c0_i32_0 = arith.constant 0 : i32
    %c0_i32_1 = arith.constant 0 : i32
    return %arg0, %c0_i32, %c0_i32_0 : i32, i32, i32
  }
  func.func @transform_1(%arg0: i32) -> (i32, i32) {
    %c0_i32 = arith.constant 0 : i32
    %c0_i32_0 = arith.constant 0 : i32
    %c0_i32_1 = arith.constant 0 : i32
    return %c0_i32, %c0_i32_0 : i32, i32
  }
  func.func @transform_2(%arg0: i32) -> (i32, i32) {
    %c0_i32 = arith.constant 0 : i32
    %c0_i32_0 = arith.constant 0 : i32
    %c0_i32_1 = arith.constant 0 : i32
    return %c0_i32, %c0_i32_0 : i32, i32
  }
  func.func @transform_3(%arg0: i32) -> (i32, i32) {
    %c0_i32 = arith.constant 0 : i32
    %c0_i32_0 = arith.constant 0 : i32
    %c0_i32_1 = arith.constant 0 : i32
    return %c0_i32, %c0_i32_0 : i32, i32
  }
  func.func @transform_4(%arg0: i32) -> (i32, i32, i32) {
    %c0_i32 = arith.constant 0 : i32
    %c0_i32_0 = arith.constant 0 : i32
    %c0_i32_1 = arith.constant 0 : i32
    return %arg0, %c0_i32, %c0_i32_0 : i32, i32, i32
  }
}

</mosaic_0001>

<bundles_post_ra>
// kernel: crm_forward.1
= control target key start
LH: loop header
LB: loop body
LE: loop exit
PB: predicated region body
PF: predicated region fallthrough
CT: control target
= control target key end

     0   :  { %s633_s15 = smov 0   ;;  %s688_s0 = inlined_call_operand.vmem [shape: f32[2,16,256], index: 0, kind: input, shape index: {}, may-alias: {0,4}]   ;;  %s689_s1 = inlined_call_operand.vmem [shape: f32[16,2], index: 1, kind: input, shape index: {}]   ;;  %s690_s2 = inlined_call_operand.vmem [shape: f32[2,2], index: 2, kind: input, shape index: {}]   ;;  %s691_s3 = inlined_call_operand.vmem [shape: f32[2,16], index: 3, kind: input, shape index: {}]   ;;  %s692_s4 = inlined_call_operand.vmem [shape: f32[2,16,256], index: 4, kind: output, shape index: {}, may-alias: {0,4}]  }
   0x1 LB: > { %s542_s16 = sadd.s32 4294967295, %s604_s15   ;;  %p546_p0 = scmp.ge.s32.totalorder %s604_s15, 1  ;;  %s604_s15 = sphi %s633_s15, %s14_s15  }
   0x2   : > { %p162_p1 = scmp.lt.s32.totalorder %s604_s15, 3 }
   0x4   : > { %p163_p2 = pnand %p546_p0, %p162_p1 }
   0x5   : > { %p188_p3 = scmp.lt.s32.totalorder (!%p163_p2), %s542_s16, 1 }
   0x6   : > { %166 = sbr.rel (%p163_p2) target bundleno = 910 (0x38e), region = 36 }
   0xb   : > { %s694_s16 = smov (!%p188_p3, %s542_s16), 1  ;;  %v606_v6 = vmov 0.0   ;;  %v211_v7 = vld [vmem:[%s689_s1 + $0x8] sm:$0xff]  ;;  %v210_v8 = vld [vmem:[%s689_s1] sm:$0xff]  ;;  %vm607_vm0 = vmmov 0   ;;  %v214_v9 = vlaneseq  ;;  %vm225_vm1 = vcmask 130112  }
   0xc   : > { %s558_s17 = sshll.u32 %s694_s16, 5  ;;  %567 = vmatprep.subr.mxu0 %v606_v6  ;;  %574 = vmatprep.subr.mxu1 %v606_v6  ;;  %vm227_vm2 = vcmask 130048   ;;  %v301_v22 = vld [vmem:[%s690_s2] sm:$0x3]  ;;  %vm306_vm3 = vcmask 1041408   ;;  %vm302_vm4 = vcmask 15360  }
   0xd   : > { %s192_s20 = scalar_lea.vmem %s688_s0, %s558_s17  ;;  %568 = vmatpush3.msra.mxu0 %v211_v7  ;;  %571 = vmatprep.mubr.msk.f32.mxu0 %vm607_vm0, %v606_v6  ;;  %v215_v10 = vand.u32 127, %v214_v9  ;;  %v217_v11 = vshrl.u32 %v214_v9, 7  ;;  %v381_v25 = vld [vmem:[%s691_s3] sm:$0x3]  ;;  %s197_s5 = scalar_lea.vmem %s692_s4, %s558_s17 }
   0xe   : > { %v649_v0 = vld [vmem:[%s192_s20] sm:$0xff]  ;;  %v651_v1 = vld [vmem:[%s192_s20 + $0x8] sm:$0xff]  ;;  %v653_v2 = vld [vmem:[%s192_s20 + $0x10] sm:$0xff]  ;;  %569 = vmatprep.subr.mxu0 %v606_v6  ;;  %576 = vmatprep.mubr.msk.f32.mxu1 %vm607_vm0, %v606_v6 }
   0xf   : > { %v202_v3 = vadd.f32 %v651_v1, %v649_v0  ;;  %v657_v4 = vld [vmem:[%s192_s20 + $0x18] sm:$0xff]  ;;  %570 = vmatpush3.msra.mxu0 %v210_v8  ;;  %v220_v12 = vadd.s32 4294967288, %v215_v10  ;;  %v218_v14 = vsub.s32 %v215_v10, %v217_v11  ;;  %575 = vmatpush3.msk.msra.mxu1 %vm306_vm3, %v301_v22  ;;  %v470_v38 = vsub.s32 0, %v217_v11 }
  0x10   : > { %v205_v5 = vadd.f32 %v657_v4, %v653_v2  ;;  %579 = vmatprep.subr.mxu1 %v606_v6 }
  0x11   : > { %203 = vadd.xlane.f32.xlu0 %v202_v3  ;;  %v223_v16 = vsub.s32 %v220_v12, %v217_v11 }
  0x15   : > { %206 = vadd.xlane.f32.xlu0 %v205_v5 }
  0x9a   : > { %v204_v13 = vpop.xlane.xlu0 %203 }
  0x9b   : > { %v208_v15 = vmul.f32 0.00390625, %v204_v13 }
  0x9d   : > { %v219_v19 = vrot.slane %v208_v15, %v218_v14 }
  0x9e   : > { %v207_v17 = vpop.xlane.xlu0 %206 }
  0x9f   : > { %v209_v18 = vmul.f32 0.00390625, %v207_v17 }
  0xa1   : > { %v224_v20 = vrot.slane %v209_v18, %v223_v16 }
  0xa3   : > { %v226_v21 = vsel %vm225_vm1, %v224_v20, %v219_v19 }
  0xa4   : > { %572 = vmatmul.mubr.msk.f32.vlgmr.msra.gmra.mxu0 %vm227_vm2, %v226_v21 }
 0x164   : > { %v296_v23 = vpop.f32.mrf.mxu0 }
 0x165   : > { %v300_v24 = vmax.f32 %v296_v23, 0.0 }
 0x166   : > { %v573_v26 = vpop.f32.mrf.mxu0 }
 0x167   : > { %577 = vmatmul.mubr.msk.f32.vlgmr.msra.gmra.mxu1 %vm302_vm4, %v300_v24 }
 0x168   : > { %580 = vmatpush3.msk.msra.mxu1 %vm306_vm3, %v381_v25  ;;  %581 = vmatprep.mubr.msk.f32.mxu1 %vm607_vm0, %v606_v6 }
 0x227   : > { %v376_v27 = vpop.f32.mrf.mxu1 }
 0x228   : > { %v380_v28 = vmax.f32 %v376_v27, 0.0 }
 0x229   : > { %v578_v29 = vpop.f32.mrf.mxu1 }
 0x22a   : > { %582 = vmatmul.mubr.msk.f32.vlgmr.msra.gmra.mxu1 %vm302_vm4, %v380_v28 }
 0x2ea   : > { %v454_v30 = vpop.f32.mrf.mxu1 }
 0x2eb   : > { %v458_v31 = vand.u32 2147483647, %v454_v30  ;;  %vm462_vm5 = vcmp.ge.f32.partialorder %v454_v30, 0.0 }
 0x2ec   : > { %v583_v32 = vpop.f32.mrf.mxu1 }
 0x2ed   : > { %v459_v33 = vsub.f32 0.0, %v458_v31 }
 0x2ef   : > { %v460_v34 = vmul.f32 1.442695, %v459_v33 }
 0x2f1   : > { %594 = vpow2.f32 %v460_v34 }
 0x2fe   : > { %v595_v35 = vpop.eup %594 }
 0x2ff   : > { %v463_v36 = vadd.f32 1.0, %v595_v35 }
 0x301   : > { %596 = vrcp.f32 %v463_v36 }
 0x30e   : > { %v597_v37 = vpop.eup %596 }
 0x30f   : > { %v466_v39 = vmul.f32 %v597_v37, %v595_v35 }
 0x311   : > { %v467_v40 = vsel %vm462_vm5, %v597_v37, %v466_v39 }
 0x312   : > { %v471_v41 = vrot.slane %v467_v40, %v470_v38 }
 0x314   : > { %473 = vbcast.lane.b32.xlu1 %v471_v41, 256 }
 0x318   : > { %477 = vbcast.lane.b32.xlu1 %v471_v41, 264 }
 0x386   : > { %v474_v42 = vpop.permute.xlu1 %473 }
 0x387   : > { %v479_v43 = vmul.f32 %v474_v42, %v649_v0  ;;  %v480_v44 = vmul.f32 %v474_v42, %v651_v1 }
 0x389   : > { %483 = vst [vmem:[%s197_s5] sm:$0xff] %v479_v43  ;;  %484 = vst [vmem:[%s197_s5 + $0x8] sm:$0xff] %v480_v44 }
 0x38a   : > { %v478_v45 = vpop.permute.xlu1 %477 }
 0x38b   : > { %v481_v46 = vmul.f32 %v478_v45, %v653_v2  ;;  %v482_v47 = vmul.f32 %v478_v45, %v657_v4 }
 0x38d   : > { %485 = vst [vmem:[%s197_s5 + $0x10] sm:$0xff] %v481_v46  ;;  %486 = vst [vmem:[%s197_s5 + $0x18] sm:$0xff] %v482_v47 }
 0x38e PF: > { %s14_s15 = sadd.s32 1, %s604_s15  }
 0x38f   : > { %p11_p4 = scmp.ge.s32.totalorder %s14_s15, 4  }
 0x391   :  { %13 = sbr.rel (!%p11_p4) target bundleno = 1 (0x1), region = 66 }

</bundles_post_ra>
